<compile_context>
chip_gen: v6e
topology: v6e:2x2x1
jax: 0.10.0
libtpu: 0.0.40
codegen_flags: <defaults>
</compile_context>

<pallas_src>
import jax
import jax.numpy as jnp
from jax.experimental import pallas as pl
from jax.experimental.pallas import tpu as pltpu

# ----------------------------- config (small synthetic ViT) -----------------------------
B = 2            # batch
C = 3            # in channels (RGB, like RETFound)
IMG = 16         # image size (PyTorch module uses 224)
PATCH = 8        # patch size (PyTorch uses 16)
NPATCH = (IMG // PATCH) ** 2      # 4 patches
SEQ = NPATCH + 1                  # +1 cls token (= 5)
SEQP = 8                          # SEQ padded to a sublane multiple
D = 32           # embed dim (PyTorch uses 1024)
HEADS = 4
DH = D // HEADS
DEPTH = 2        # (PyTorch uses 24)
MLP = 4 * D
EPS = 1e-6       # partial(nn.LayerNorm, eps=1e-6) in RETFound_mae
CPP = C * PATCH * PATCH
BT = 2           # images per grid step (amortizes per-layer weight DMA)


# ----------------------------- Pallas kernels -----------------------------
def _patch_embed_kernel(x_ref, w_ref, b_ref, o_ref):
    # PatchEmbed Conv2d(kernel=stride=PATCH) == one matmul over flattened patches.
    x = x_ref[...].astype(jnp.float32)
    w = w_ref[...].astype(jnp.float32)
    y = jnp.dot(x, w, preferred_element_type=jnp.float32) + b_ref[...].astype(jnp.float32)
    o_ref[...] = y.astype(o_ref.dtype)


def _encoder_blocks_kernel(
    xt_ref,       # (BT, SEQP, D)   token sequences for this batch tile
    vec_ref,      # (1, 9, D)       [ln1_g, ln1_b, ln2_g, ln2_b, proj_b, fc2_b, q_b, k_b, v_b]
    qkvw_ref,     # (1, D, 3D)      fused qkv weight
    projw_ref,    # (1, D, D)
    fc1w_ref,     # (1, D, MLP)
    fc1b_ref,     # (1, 1, MLP)
    fc2w_ref,     # (1, MLP, D)
    fcn_ref,      # (2, D)          fc_norm gamma / beta
    o_ref,        # (BT, D)
    x_scr,        # VMEM (BT*SEQP, D) f32 — activation carried across depth
):
    """One grid step = (one batch tile, one transformer block). grid=(B//BT, DEPTH)."""
    l = pl.program_id(1)

    # First block for this batch tile: load its token sequences into VMEM scratch.
    # They stay resident for the entire depth loop (no HBM round-trips).
    @pl.when(l == 0)
    def _():
        x_scr[...] = xt_ref[...].reshape(BT * SEQP, D).astype(jnp.float32)

    def layer_norm(z, g, b):
        mu = jnp.mean(z, axis=-1, keepdims=True)
        var = jnp.mean(jnp.square(z - mu), axis=-1, keepdims=True)
        return (z - mu) * jax.lax.rsqrt(var + EPS) * g + b

    vec = vec_ref[0].astype(jnp.float32)            # (9, D)
    ln1_g, ln1_b = vec[0:1], vec[1:2]
    ln2_g, ln2_b = vec[2:3], vec[3:4]
    proj_b, fc2_b = vec[4:5], vec[5:6]
    q_b, k_b, v_b = vec[6:7], vec[7:8], vec[8:9]

    x = x_scr[...]                                   # (BT*SEQP, D), f32, VMEM resident

    # ---- attention branch: x = x + proj(MHSA(LN1(x))) ----
    h = layer_norm(x, ln1_g, ln1_b)
    qkv = jnp.dot(h, qkvw_ref[0].astype(jnp.float32),
                  preferred_element_type=jnp.float32)          # ONE fused (M,D)@(D,3D) matmul
    scale = DH ** -0.5
    q = ((qkv[:, 0:D] + q_b) * scale).reshape(BT, SEQP, D)     # 1/sqrt(dh) folded into q
    k = (qkv[:, D:2 * D] + k_b).reshape(BT, SEQP, D)
    v = (qkv[:, 2 * D:3 * D] + v_b).reshape(BT, SEQP, D)

    # mask for padded key positions (hoisted out of the head loop; JAX won't CSE it)
    key_valid = jax.lax.broadcasted_iota(jnp.int32, (1, 1, SEQP), 2) < SEQ

    heads = []
    for hd in range(HEADS):                          # static unroll over heads
        sl = slice(hd * DH, (hd + 1) * DH)
        # contract last axes of q and k directly — no materialized k.T
        s = jnp.einsum("bqd,bkd->bqk", q[:, :, sl], k[:, :, sl],
                       preferred_element_type=jnp.float32)     # (BT, SEQP, SEQP)
        s = jnp.where(key_valid, s, -1e30)
        s = s - jnp.max(s, axis=-1, keepdims=True)
        p = jnp.exp(s)
        p = p * pl.reciprocal(jnp.sum(p, axis=-1, keepdims=True), approx=True)
        heads.append(jnp.einsum("bqk,bkd->bqd", p, v[:, :, sl],
                                preferred_element_type=jnp.float32))
    # lane-concat head outputs, then ONE K=D output projection
    attn = jnp.concatenate(heads, axis=-1).reshape(BT * SEQP, D)
    x = x + jnp.dot(attn, projw_ref[0].astype(jnp.float32),
                    preferred_element_type=jnp.float32) + proj_b

    # ---- MLP branch: x = x + fc2(GELU(fc1(LN2(x)))) ----
    h = layer_norm(x, ln2_g, ln2_b)
    h = jnp.dot(h, fc1w_ref[0].astype(jnp.float32),
                preferred_element_type=jnp.float32) + fc1b_ref[0].astype(jnp.float32)
    h = jax.nn.gelu(h, approximate=False)            # exact erf GELU (torch.nn.GELU default)
    x = x + jnp.dot(h, fc2w_ref[0].astype(jnp.float32),
                    preferred_element_type=jnp.float32) + fc2_b

    x_scr[...] = x

    # ---- after the last block: mean over patch tokens (exclude cls & pad) + fc_norm ----
    @pl.when(l == DEPTH - 1)
    def _():
        x3 = x.reshape(BT, SEQP, D)
        ridx = jax.lax.broadcasted_iota(jnp.int32, (1, SEQP, 1), 1)
        pool_w = jnp.where((ridx >= 1) & (ridx < SEQ), 1.0 / NPATCH, 0.0)
        pooled = jnp.sum(x3 * pool_w, axis=1)        # (BT, D)
        fcn = fcn_ref[...].astype(jnp.float32)
        o_ref[...] = layer_norm(pooled, fcn[0:1], fcn[1:2]).astype(o_ref.dtype)


# ----------------------------- pallas_call wrappers -----------------------------
def patch_embed(x2d, w, b):
    # TODO(synk): at real ViT-L sizes tile this over 128/256-row M blocks (or fold
    # it into the encoder kernel's l==0 step) instead of one full-array block.
    M, K = x2d.shape
    N = w.shape[1]
    return pl.pallas_call(
        _patch_embed_kernel,
        out_shape=jax.ShapeDtypeStruct((M, N), x2d.dtype),
        in_specs=[pl.BlockSpec((M, K), lambda: (0, 0)),
                  pl.BlockSpec((K, N), lambda: (0, 0)),
                  pl.BlockSpec((1, N), lambda: (0, 0))],
        out_specs=pl.BlockSpec((M, N), lambda: (0, 0)),
    )(x2d, w, b)


def encoder_blocks(xt, params):
    Bb = xt.shape[0]
    assert Bb % BT == 0, "batch must be a multiple of the batch tile"
    grid = (Bb // BT, DEPTH)

    def layer_spec(*shape):
        """Per-layer weight block of the DEPTH-stacked parameter arrays."""
        zeros = (0,) * len(shape)
        return pl.BlockSpec((1,) + tuple(shape), lambda b, l: (l,) + zeros)

    in_specs = [
        pl.BlockSpec((BT, SEQP, D), lambda b, l: (b, 0, 0)),   # token sequences (batch tile)
        layer_spec(9, D),          # packed ln/bias slab
        layer_spec(D, 3 * D),      # fused qkv weight
        layer_spec(D, D),          # proj weight
        layer_spec(D, MLP),        # fc1 weight
        layer_spec(1, MLP),        # fc1 bias
        layer_spec(MLP, D),        # fc2 weight
        pl.BlockSpec((2, D), lambda b, l: (0, 0)),             # fc_norm gamma / beta
    ]

    return pl.pallas_call(
        _encoder_blocks_kernel,
        out_shape=jax.ShapeDtypeStruct((Bb, D), xt.dtype),
        grid=grid,
        in_specs=in_specs,
        out_specs=pl.BlockSpec((BT, D), lambda b, l: (b, 0)),  # ignores l (see invariant)
        scratch_shapes=[pltpu.VMEM((BT * SEQP, D), jnp.float32)],
        compiler_params=pltpu.CompilerParams(
            dimension_semantics=("parallel", "arbitrary"),
            vmem_limit_bytes=32 * 1024 * 1024),
    )(xt, params["vec"], params["qkv_w"], params["proj_w"],
      params["fc1_w"], params["fc1_b"], params["fc2_w"], params["fc_norm"])


# ----------------------------- parameters -----------------------------
def init_params(key):
    def nrm(k, shape, std=0.02):
        return jax.random.normal(k, shape, jnp.float32) * std

    ks = jax.random.split(key, 11)
    p = {}
    p["patch_w"] = nrm(ks[0], (CPP, D))
    p["patch_b"] = nrm(ks[1], (1, D))
    p["cls_token"] = nrm(ks[2], (1, 1, D))
    p["pos_embed"] = nrm(ks[3], (1, SEQ, D))

    # Transformer-block weights stacked with a leading DEPTH axis so the fused
    # pallas_call prefetches layer l+1's weights while layer l computes.
    p["qkv_w"] = nrm(ks[4], (DEPTH, D, 3 * D))     # [Wq | Wk | Wv] along lanes
    p["proj_w"] = nrm(ks[5], (DEPTH, D, D))
    p["fc1_w"] = nrm(ks[6], (DEPTH, D, MLP))
    p["fc1_b"] = nrm(ks[7], (DEPTH, 1, MLP))
    p["fc2_w"] = nrm(ks[8], (DEPTH, MLP, D))

    # Packed slab of small per-layer vectors:
    # rows = [ln1_g, ln1_b, ln2_g, ln2_b, proj_b, fc2_b, q_b, k_b, v_b]
    vec = nrm(ks[9], (DEPTH, 9, D))
    vec = vec.at[:, 0].add(1.0).at[:, 2].add(1.0)  # LN gammas ~ 1
    p["vec"] = vec

    fcn = nrm(ks[10], (2, D))                      # fc_norm [gamma; beta]
    fcn = fcn.at[0].add(1.0)
    p["fc_norm"] = fcn
    return p


# ----------------------------- forward pass -----------------------------
def retfound_encoder_forward(x, params):
    # x is NCHW (B, C, H, W), same as the PyTorch module's conv input.
    Bb, Cc, H, W = x.shape
    # patchify (pure layout glue): channel-major flatten, matching Conv2d weight layout
    xp = x.reshape(Bb, Cc, H // PATCH, PATCH, W // PATCH, PATCH)
    xp = xp.transpose(0, 2, 4, 1, 3, 5).reshape(Bb * NPATCH, CPP)

    # PatchEmbed conv(stride=patch) == matmul (Pallas)
    tok = patch_embed(xp, params["patch_w"], params["patch_b"]).reshape(Bb, NPATCH, D)

    # cls token + positional embedding (elementwise glue), pad SEQ -> SEQP
    cls = jnp.broadcast_to(params["cls_token"], (Bb, 1, D))
    xt = jnp.concatenate([cls, tok], axis=1) + params["pos_embed"]     # (B, SEQ, D)
    xt = jnp.pad(xt, ((0, 0), (0, SEQP - SEQ), (0, 0)))                # (B, SEQP, D)

    # all transformer blocks + global mean pool + fc_norm: ONE fused Pallas call
    return encoder_blocks(xt, params)


# ----------------------------- pure-JAX reference (for sanity) -----------------------------
def reference_forward(x, params):
    Bb = x.shape[0]
    xp = x.reshape(Bb, C, IMG // PATCH, PATCH, IMG // PATCH, PATCH)
    xp = xp.transpose(0, 2, 4, 1, 3, 5).reshape(Bb, NPATCH, CPP)
    tok = xp @ params["patch_w"] + params["patch_b"]
    xt = jnp.concatenate([jnp.broadcast_to(params["cls_token"], (Bb, 1, D)), tok], 1) \
        + params["pos_embed"]

    def ln(z, g, b):
        mu = z.mean(-1, keepdims=True)
        var = ((z - mu) ** 2).mean(-1, keepdims=True)
        return (z - mu) * jax.lax.rsqrt(var + EPS) * g + b

    for l in range(DEPTH):
        vec = params["vec"][l]
        ln1_g, ln1_b, ln2_g, ln2_b = vec[0], vec[1], vec[2], vec[3]
        proj_b, fc2_b = vec[4], vec[5]
        q_b, k_b, v_b = vec[6], vec[7], vec[8]
        qkvw = params["qkv_w"][l]
        wq, wk, wv = qkvw[:, :D], qkvw[:, D:2 * D], qkvw[:, 2 * D:]

        h = ln(xt, ln1_g, ln1_b)
        q = (h @ wq + q_b).reshape(Bb, SEQ, HEADS, DH).transpose(0, 2, 1, 3)
        k = (h @ wk + k_b).reshape(Bb, SEQ, HEADS, DH).transpose(0, 2, 1, 3)
        v = (h @ wv + v_b).reshape(Bb, SEQ, HEADS, DH).transpose(0, 2, 1, 3)
        s = jnp.einsum("bhqd,bhkd->bhqk", q, k) * (DH ** -0.5)
        pr = jax.nn.softmax(s, -1)
        ao = jnp.einsum("bhqk,bhkd->bhqd", pr, v).transpose(0, 2, 1, 3).reshape(Bb, SEQ, D)
        xt = xt + (ao @ params["proj_w"][l] + proj_b)
        h = ln(xt, ln2_g, ln2_b)
        h = jax.nn.gelu(h @ params["fc1_w"][l] + params["fc1_b"][l], approximate=False)
        xt = xt + (h @ params["fc2_w"][l] + fc2_b)
    pooled = xt[:, 1:, :].mean(1)
    return ln(pooled, params["fc_norm"][0], params["fc_norm"][1])


# ----------------------------- main -----------------------------
if __name__ == "__main__":
    key = jax.random.PRNGKey(0)
    kx, kp = jax.random.split(key)
    x = jax.random.normal(kx, (B, C, IMG, IMG), jnp.float32)   # NCHW, like the PyTorch module
    params = init_params(kp)

    out = jax.block_until_ready(retfound_encoder_forward(x, params))
    assert out.shape == (B, D), out.shape

    ref = jax.block_until_ready(reference_forward(x, params))
    # tolerance slightly loosened vs. pure-f32 because of the approx-EUP softmax reciprocal
    if not jnp.allclose(out, ref, rtol=1e-3, atol=1e-3):
        err = float(jnp.max(jnp.abs(out - ref)))
        raise AssertionError(f"Pallas output does not match JAX reference (max abs err {err})")

    print("KERNEL_OK")
</pallas_src>

<mosaic_0001>
module attributes {stable_mosaic.version = 11 : i64} {
  func.func @_patch_embed_kernel(%arg0: memref<8x192xf32, #tpu.memory_space<vmem>>, %arg1: memref<192x32xf32, #tpu.memory_space<vmem>>, %arg2: memref<1x32xf32, #tpu.memory_space<vmem>>, %arg3: memref<8x32xf32, #tpu.memory_space<vmem>>) attributes {dimension_semantics = [], scalar_prefetch = 0 : i64, scratch_operands = 0 : i64, tpu.core_type = #tpu.core_type<tc>} {
    %c0 = arith.constant 0 : index
    %c0_0 = arith.constant 0 : index
    %0 = vector.load %arg0[%c0, %c0_0] : memref<8x192xf32, #tpu.memory_space<vmem>>, vector<8x192xf32>
    %c0_1 = arith.constant 0 : index
    %c0_2 = arith.constant 0 : index
    %1 = vector.load %arg1[%c0_1, %c0_2] : memref<192x32xf32, #tpu.memory_space<vmem>>, vector<192x32xf32>
    %cst = arith.constant dense<0.000000e+00> : vector<8x32xf32>
    %2 = tpu.matmul %0, %1, %cst {dimension_numbers = #tpu.dot_dimension_numbers<[1], [0], [0], [1], [0, 0, 1, 1], [], []>} : vector<8x192xf32>, vector<192x32xf32>, vector<8x32xf32> -> vector<8x32xf32>
    %c0_3 = arith.constant 0 : index
    %c0_4 = arith.constant 0 : index
    %3 = vector.load %arg2[%c0_3, %c0_4] : memref<1x32xf32, #tpu.memory_space<vmem>>, vector<1x32xf32>
    %4 = vector.broadcast %3 : vector<1x32xf32> to vector<8x32xf32>
    %5 = arith.addf %2, %4 : vector<8x32xf32>
    %c0_5 = arith.constant 0 : index
    %c0_6 = arith.constant 0 : index
    %6 = vector.load %arg3[%c0_5, %c0_6] : memref<8x32xf32, #tpu.memory_space<vmem>>, vector<8x32xf32>
    tpu.vector_store %arg3[%c0_5, %c0_6], %5 {strides = array<i32>} : memref<8x32xf32, #tpu.memory_space<vmem>>, vector<8x32xf32>,
    return
  }
}

</mosaic_0001>

<bundles_post_ra>
// kernel: tpu_custom_call.1
= control target key start
LH: loop header
LB: loop body
LE: loop exit
PB: predicated region body
PF: predicated region fallthrough
CT: control target
= control target key end

     0   :  { %v164_v1 = vmov 0.0   ;;  %vm48_vm0 = vcmask 523264   ;;  %s294_s0 = inlined_call_operand.vmem [shape: f32[8,192], index: 0, kind: input, shape index: {}]   ;;  %s295_s1 = inlined_call_operand.vmem [shape: f32[192,32], index: 1, kind: input, shape index: {}]   ;;  %s296_s2 = inlined_call_operand.vmem [shape: f32[1,32], index: 2, kind: input, shape index: {}]   ;;  %s297_s3 = inlined_call_operand.hbm [shape: f32[8,32], index: 3, kind: output, shape index: {}]  }
   0x1   :  { %v32_v0 = vld [vmem:[%s295_s1 + $0x78] sm:$0xff]  ;;  %52 = vmatprep.subr.mxu0 %v164_v1  ;;  %v31_v2 = vld [vmem:[%s295_s1 + $0x70] sm:$0xff]  ;;  %v30_v3 = vld [vmem:[%s295_s1 + $0x68] sm:$0xff] }
   0x2   :  { %53 = vmatpush1.msra.mxu0 %v32_v0  ;;  %v29_v4 = vld [vmem:[%s295_s1 + $0x60] sm:$0xff]  ;;  %v28_v5 = vld [vmem:[%s295_s1 + $0x58] sm:$0xff]  ;;  %v16_v6 = vld [vmem:[%s294_s0 + $0x8] sm:$0xff] }
   0x3   :  { %54 = vmatprep.subr.mxu0 %v164_v1  ;;  %v27_v7 = vld [vmem:[%s295_s1 + $0x50] sm:$0xff]  ;;  %139 = vmatprep.mubr.msk.f32.mxu0 %vm48_vm0, %v16_v6 }
   0x4   :  { %55 = vmatpush1.msra.mxu0 %v31_v2 }
   0x5   :  { %56 = vmatprep.subr.mxu0 %v164_v1 }
   0x6   :  { %57 = vmatpush1.msra.mxu0 %v30_v3 }
   0x7   :  { %58 = vmatprep.subr.mxu0 %v164_v1 }
   0x8   :  { %59 = vmatpush1.msra.mxu0 %v29_v4 }
   0x9   :  { %60 = vmatprep.subr.mxu0 %v164_v1 }
   0xa   :  { %8 = vsyncpa [#allocation3], 0  ;;  %61 = vmatpush1.msra.mxu0 %v28_v5  ;;  %v26_v8 = vld [vmem:[%s295_s1 + $0x48] sm:$0xff]  ;;  %v25_v9 = vld [vmem:[%s295_s1 + $0x40] sm:$0xff]  ;;  %s165_s12 = smov [#allocation2]   ;;  %vm122_vm1 = vcmask 261120  }
   0xb   :  { %62 = vmatprep.subr.mxu0 %v164_v1  ;;  %v24_v10 = vld [vmem:[%s295_s1 + $0x38] sm:$0xff]  ;;  %v23_v11 = vld [vmem:[%s295_s1 + $0x30] sm:$0xff]  ;;  %v22_v12 = vld [vmem:[%s295_s1 + $0x28] sm:$0xff]  ;;  %s130_s13 = sshll.u32 %s165_s12, 4  ;;  %s131_s13 = int_to_ptr.vmem [resolvable:$true] %s130_s13 }
   0xc   :  { %63 = vmatpush1.msra.mxu0 %v27_v7  ;;  %v21_v13 = vld [vmem:[%s295_s1 + $0x20] sm:$0xff]  ;;  %v20_v14 = vld [vmem:[%s295_s1 + $0x18] sm:$0xff]  ;;  %v19_v15 = vld [vmem:[%s295_s1 + $0x10] sm:$0xff]  ;;  %p147_p1 = scmp.lt.s32.totalorder %s131_s13, %s131_s13 }
   0xd   :  { %64 = vmatprep.subr.mxu0 %v164_v1  ;;  %v18_v16 = vld [vmem:[%s295_s1 + $0x8] sm:$0xff]  ;;  %v17_v17 = vld [vmem:[%s295_s1] sm:$0xff]  ;;  %v40_v18 = vld [vmem:[%s295_s1 + $0xb8] sm:$0xff] }
   0xe   :  { %65 = vmatpush1.msra.mxu0 %v26_v8  ;;  %v39_v19 = vld [vmem:[%s295_s1 + $0xb0] sm:$0xff]  ;;  %v38_v20 = vld [vmem:[%s295_s1 + $0xa8] sm:$0xff]  ;;  %v37_v21 = vld [vmem:[%s295_s1 + $0xa0] sm:$0xff] }
   0xf   :  { %66 = vmatprep.subr.mxu0 %v164_v1  ;;  %v36_v22 = vld [vmem:[%s295_s1 + $0x98] sm:$0xff]  ;;  %v35_v23 = vld [vmem:[%s295_s1 + $0x90] sm:$0xff]  ;;  %v34_v24 = vld [vmem:[%s295_s1 + $0x88] sm:$0xff] }
  0x10   :  { %67 = vmatpush1.msra.mxu0 %v25_v9  ;;  %v33_v25 = vld [vmem:[%s295_s1 + $0x80] sm:$0xff]  ;;  %s142_s1 = scalar_lea.vmem %s131_s13, 128 }
  0x11   :  { %68 = vmatprep.subr.mxu0 %v164_v1  ;;  %v15_v26 = vld [vmem:[%s294_s0] sm:$0xff]  ;;  %p143_p0 = scmp.ne.s32.totalorder %s131_s13, %s142_s1  ;;  %p148_p2 = scmp.lt.s32.totalorder %s142_s1, %s142_s1 }
  0x12   :  { %69 = vmatpush1.msra.mxu0 %v24_v10  ;;  %v138_v27 = vld [vmem:[%s296_s2] ss:$0 sm:$0xff] }
  0x13   :  { %70 = vmatprep.subr.mxu0 %v164_v1  ;;  %p149_p3 = por %p148_p2, %p147_p1 }
  0x14   :  { %71 = vmatpush1.msra.mxu0 %v23_v11 }
  0x15   :  { %72 = vmatprep.subr.mxu0 %v164_v1  ;;  %p150_p4 = pnand %p149_p3, %p143_p0 }
  0x16   :  { %73 = vmatpush1.msra.mxu0 %v22_v12 }
  0x17   :  { %74 = vmatprep.subr.mxu0 %v164_v1 }
  0x18   :  { %75 = vmatpush1.msra.mxu0 %v21_v13 }
  0x19   :  { %76 = vmatprep.subr.mxu0 %v164_v1 }
  0x1a   :  { %77 = vmatpush1.msra.mxu0 %v20_v14 }
  0x1b   :  { %78 = vmatprep.subr.mxu0 %v164_v1 }
  0x1c   :  { %79 = vmatpush1.msra.mxu0 %v19_v15 }
  0x1d   :  { %80 = vmatprep.subr.mxu0 %v164_v1 }
  0x1e   :  { %81 = vmatpush1.msra.mxu0 %v18_v16 }
  0x1f   :  { %82 = vmatprep.subr.mxu0 %v164_v1 }
  0x20   :  { %83 = vmatpush1.msra.mxu0 %v17_v17 }
  0x21   :  { %100 = vmatprep.subr.mxu0 %v164_v1 }
  0x22   :  { %101 = vmatpush2.msra.mxu0 %v40_v18 }
  0x23   :  { %102 = vmatprep.subr.mxu0 %v164_v1 }
  0x24   :  { %103 = vmatpush2.msra.mxu0 %v39_v19 }
  0x25   :  { %104 = vmatprep.subr.mxu0 %v164_v1 }
  0x26   :  { %105 = vmatpush2.msra.mxu0 %v38_v20 }
  0x27   :  { %106 = vmatprep.subr.mxu0 %v164_v1 }
  0x28   :  { %107 = vmatpush2.msra.mxu0 %v37_v21 }
  0x29   :  { %108 = vmatprep.subr.mxu0 %v164_v1 }
  0x2a   :  { %109 = vmatpush2.msra.mxu0 %v36_v22 }
  0x2b   :  { %110 = vmatprep.subr.mxu0 %v164_v1 }
  0x2c   :  { %111 = vmatpush2.msra.mxu0 %v35_v23 }
  0x2d   :  { %112 = vmatprep.subr.mxu0 %v164_v1 }
  0x2e   :  { %113 = vmatpush2.msra.mxu0 %v34_v24 }
  0x2f   :  { %114 = vmatprep.subr.mxu0 %v164_v1 }
  0x30   :  { %115 = vmatpush2.msra.mxu0 %v33_v25 }
  0x31   :  { %117 = vmatmul.mubr.f32.vlgmr.msra.gmra.mxu0 %v15_v26 }
  0xf1   :  { %v118_v28 = vpop.f32.mrf.mxu0 }
  0xf2   :  { %v119_v29 = vadd.f32 %v138_v27, %v118_v28 }
  0xf3   :  { %v120_v30 = vpop.f32.mrf.mxu0 }
  0xf4   :  { %123 = vst.msk [vmem:[#allocation2] sm:$0xff] %vm122_vm1, %v119_v29 }
  0xf5   :  { %153 = shalt.err (!%p150_p4)
}
  0xf6   :  { %133 = dma.vmem_to_hbm [thread:$0]  %s131_s13, 128, %s297_s3, [#allocation3]  }
  0xf7   :  { %162 = dma.done.wait [#allocation3], 128  }
  0xf8   :  { %163 = vsyncadd [#allocation3], 4294967168 }
  0xf9   :  { %137 = vsyncpa [#allocation3], 1 }

</bundles_post_ra>
